<compile_context>
chip_gen: v7x
topology: tpu7x:2x2x1
jax: 0.10.0
libtpu: 0.0.40
codegen_flags: <defaults>
</compile_context>

<pallas_src>
import functools

import jax
import jax.numpy as jnp
from jax.experimental import pallas as pl
from jax.experimental.pallas import tpu as pltpu

LANE = 128


def _dice_kernel(x_ref, t_ref, inter_out, den_out, inter_acc, den_acc, *,
                 steps, tile_rows, full_rows, rem_lanes, last_block, mask_last):
    """grid = (splits, steps): axis 0 is 'parallel' (per-core partials),
    axis 1 walks this split's row-tiles sequentially ('arbitrary')."""
    c = pl.program_id(0)
    i = pl.program_id(1)

    @pl.when(i == 0)
    def _():
        inter_acc[...] = jnp.zeros_like(inter_acc)
        den_acc[...] = jnp.zeros_like(den_acc)

    # sigmoid(x) == 0.5*tanh(0.5*x) + 0.5 : one EUP op instead of exp +
    # reciprocal + range handling.  Frees VALU/EUP slots (matters on v7x).
    x = 0.5 * jnp.tanh(0.5 * x_ref[...].astype(jnp.float32)) + 0.5
    t = t_ref[...].astype(jnp.float32)

    groups = tile_rows // 8

    def accumulate(xv, tv):
        # Reduce the (tile_rows, 128) tile to one (8, 128) vreg per quantity
        # via a sublane-tile tree-sum (pure VPU adds, no cross-lane work),
        # then add into the tiny persistent accumulators.
        inter_acc[...] += jnp.sum((xv * tv).reshape(groups, 8, LANE), axis=0)
        den_acc[...] += jnp.sum((xv + tv).reshape(groups, 8, LANE), axis=0)

    if mask_last:
        blk = c * steps + i

        @pl.when(blk != last_block)
        def _():
            accumulate(x, t)          # fast unmasked path for interior tiles

        @pl.when(blk == last_block)
        def _():
            # Row-index mask for the final tile only: zeroes lane padding,
            # the ragged tail row, and Pallas block padding past the array.
            row_ids = jax.lax.broadcasted_iota(jnp.int32, (tile_rows, LANE), 0)
            col_ids = jax.lax.broadcasted_iota(jnp.int32, (tile_rows, LANE), 1)
            grow = last_block * tile_rows + row_ids      # static base offset
            valid = (grow < full_rows) | ((grow == full_rows) &
                                          (col_ids < rem_lanes))
            accumulate(jnp.where(valid, x, 0.0), jnp.where(valid, t, 0.0))
    else:
        accumulate(x, t)

    @pl.when(i == pl.num_programs(1) - 1)
    def _():
        # Dump the (8,128) partials; the trivial cross-lane reduce happens in
        # the wrapper on 8 KiB of data.
        inter_out[0] = inter_acc[...]
        den_out[0] = den_acc[...]


def _sublane_multiple(dtype):
    itemsize = jnp.dtype(dtype).itemsize
    return 8 * max(1, 4 // itemsize)      # f32: 8, bf16: 16, int8: 32


def _vmem_capacity_bytes():
    try:
        info = pltpu.get_tpu_info()
        cap = getattr(info, "vmem_capacity_bytes", None)
        if cap:
            return int(cap)
    except Exception:
        pass
    return 64 * 1024 * 1024               # conservative: v7x per-TC VMEM


def _num_tensorcores():
    try:
        info = pltpu.get_tpu_info()
        for name in ("num_cores", "core_count", "num_tensorcores",
                     "tensorcore_count", "cores_per_chip"):
            n = getattr(info, name, None)
            if n:
                return max(1, int(n))
    except Exception:
        pass
    return 1                              # safe default for v5e/v6e


def dice_loss(inputs, targets, smooth=1.0, tile_rows=None, num_splits=None):
    """Pallas implementation of DiceLoss.forward(inputs, targets, smooth)."""
    assert inputs.shape == targets.shape
    total = int(inputs.size)

    x_flat = inputs.reshape(-1)
    t_flat = targets.reshape(-1)

    # Minimal pad only if needed to form a lane-dense (rows, 128) view; the
    # padded elements are masked out inside the kernel.
    rem = total % LANE
    if rem:
        pad = LANE - rem
        x_flat = jnp.pad(x_flat, (0, pad))
        t_flat = jnp.pad(t_flat, (0, pad))
    rows = x_flat.shape[0] // LANE

    x2d = x_flat.reshape(rows, LANE)
    t2d = t_flat.reshape(rows, LANE)

    xb = x2d.dtype.itemsize
    tb = t2d.dtype.itemsize
    sub = max(_sublane_multiple(x2d.dtype), _sublane_multiple(t2d.dtype))

    # Tile size from the VMEM budget: 2x double-buffered inputs plus f32
    # elementwise/mask temporaries, keep well under half of physical VMEM.
    cap = max(_vmem_capacity_bytes(), 32 * 1024 * 1024)
    budget = cap // 2
    per_row = LANE * (2 * (xb + tb) + 24)
    tr_cap = max(sub, (budget // per_row) // sub * sub)

    tr = int(tile_rows) if tile_rows is not None else 8192
    tr = max(1, min(tr, tr_cap, rows))
    tr = ((tr + sub - 1) // sub) * sub    # sublane-packing requirement

    num_blocks = -(-rows // tr)

    # One partial per TensorCore; only use splits that divide num_blocks
    # evenly (no clamped overflow steps, balanced per-core work).
    desired = int(num_splits) if num_splits is not None else _num_tensorcores()
    desired = max(1, min(desired, num_blocks))
    nsplits = 1
    for s in range(desired, 0, -1):
        if num_blocks % s == 0:
            nsplits = s
            break
    steps = num_blocks // nsplits

    full_rows = total // LANE
    rem_lanes = total % LANE
    mask_last = total != num_blocks * tr * LANE   # static: skip mask entirely if exact

    in_spec = pl.BlockSpec((tr, LANE), lambda c, i: (c * steps + i, 0))
    out_spec = pl.BlockSpec((1, 8, LANE), lambda c, i: (c, 0, 0))

    acc_bytes = 2 * 8 * LANE * 4
    vmem_limit = per_row * tr + acc_bytes + (8 << 20)
    vmem_limit = int(max(16 << 20, min(vmem_limit, cap - (4 << 20))))

    kernel = functools.partial(
        _dice_kernel, steps=steps, tile_rows=tr, full_rows=full_rows,
        rem_lanes=rem_lanes, last_block=num_blocks - 1, mask_last=mask_last)

    inter_p, den_p = pl.pallas_call(
        kernel,
        out_shape=(jax.ShapeDtypeStruct((nsplits, 8, LANE), jnp.float32),
                   jax.ShapeDtypeStruct((nsplits, 8, LANE), jnp.float32)),
        grid_spec=pltpu.PrefetchScalarGridSpec(
            num_scalar_prefetch=0,
            grid=(nsplits, steps),
            in_specs=[in_spec, in_spec],
            out_specs=(out_spec, out_spec),
            scratch_shapes=[pltpu.VMEM((8, LANE), jnp.float32),
                            pltpu.VMEM((8, LANE), jnp.float32)],
        ),
        compiler_params=pltpu.CompilerParams(
            dimension_semantics=("parallel", "arbitrary"),
            vmem_limit_bytes=vmem_limit,
        ),
    )(x2d, t2d)

    inter = jnp.sum(inter_p)
    den = jnp.sum(den_p)
    smooth = jnp.float32(smooth)
    return (2.0 * inter + smooth) / (den + smooth)


def _reference(inputs, targets, smooth=1.0):
    x = jax.nn.sigmoid(inputs.astype(jnp.float32)).reshape(-1)
    t = targets.astype(jnp.float32).reshape(-1)
    inter = jnp.sum(x * t)
    return (2.0 * inter + smooth) / (jnp.sum(x) + jnp.sum(t) + smooth)


if __name__ == "__main__":
    key = jax.random.PRNGKey(0)
    k1, k2 = jax.random.split(key)

    # NCHW-shaped logits and binary targets (DiceLoss has no parameters).
    x = jax.random.normal(k1, (2, 4, 16, 16), dtype=jnp.float32)
    t = (jax.random.uniform(k2, (2, 4, 16, 16)) > 0.5).astype(jnp.float32)

    dice = dice_loss(x, t, smooth=1.0)
    jax.block_until_ready(dice)

    ref = _reference(x, t, smooth=1.0)
    assert jnp.allclose(dice, ref, rtol=1e-5, atol=1e-6), (dice, ref)

    print("KERNEL_OK")
</pallas_src>

<mosaic_0001>
module attributes {stable_mosaic.version = 11 : i64} {
  func.func @_dice_kernel(%arg0: i32, %arg1: i32, %arg2: memref<16x128xf32, #tpu.memory_space<vmem>>, %arg3: memref<16x128xf32, #tpu.memory_space<vmem>>, %arg4: memref<1x8x128xf32, #tpu.memory_space<vmem>>, %arg5: memref<1x8x128xf32, #tpu.memory_space<vmem>>, %arg6: memref<8x128xf32, #tpu.memory_space<vmem>>, %arg7: memref<8x128xf32, #tpu.memory_space<vmem>>) attributes {dimension_semantics = [#tpu.dimension_semantics<parallel>, #tpu.dimension_semantics<arbitrary>], iteration_bounds = array<i64: 1, 1>, scalar_prefetch = 0 : i64, scratch_operands = 2 : i64, tpu.core_type = #tpu.core_type<tc>, window_params = [{transform_indices = @transform_0, window_bounds = array<i64: 16, 128>}, {transform_indices = @transform_1, window_bounds = array<i64: 16, 128>}, {transform_indices = @transform_2, window_bounds = array<i64: 1, 8, 128>}, {transform_indices = @transform_3, window_bounds = array<i64: 1, 8, 128>}]} {
    %c0_i32 = arith.constant 0 : i32
    %0 = arith.cmpi eq, %arg1, %c0_i32 : i32
    %1 = arith.extui %0 : i1 to i32
    %c0_i32_0 = arith.constant 0 : i32
    %2 = arith.cmpi ne, %1, %c0_i32_0 : i32
    scf.if %2 {
      %cst_18 = arith.constant 0.000000e+00 : f32
      %27 = vector.broadcast %cst_18 : f32 to vector<8x128xf32>
      %c0_19 = arith.constant 0 : index
      %c0_20 = arith.constant 0 : index
      %28 = vector.load %arg6[%c0_19, %c0_20] : memref<8x128xf32, #tpu.memory_space<vmem>>, vector<8x128xf32>
      tpu.vector_store %arg6[%c0_19, %c0_20], %27 {strides = array<i32>} : memref<8x128xf32, #tpu.memory_space<vmem>>, vector<8x128xf32>,
      %cst_21 = arith.constant 0.000000e+00 : f32
      %29 = vector.broadcast %cst_21 : f32 to vector<8x128xf32>
      %c0_22 = arith.constant 0 : index
      %c0_23 = arith.constant 0 : index
      %30 = vector.load %arg7[%c0_22, %c0_23] : memref<8x128xf32, #tpu.memory_space<vmem>>, vector<8x128xf32>
      tpu.vector_store %arg7[%c0_22, %c0_23], %29 {strides = array<i32>} : memref<8x128xf32, #tpu.memory_space<vmem>>, vector<8x128xf32>,
    } else {
    }
    %c0 = arith.constant 0 : index
    %c0_1 = arith.constant 0 : index
    %3 = vector.load %arg2[%c0, %c0_1] : memref<16x128xf32, #tpu.memory_space<vmem>>, vector<16x128xf32>
    %cst = arith.constant 5.000000e-01 : f32
    %4 = vector.broadcast %cst : f32 to vector<16x128xf32>
    %5 = arith.mulf %4, %3 : vector<16x128xf32>
    %6 = math.tanh %5 : vector<16x128xf32>
    %cst_2 = arith.constant 5.000000e-01 : f32
    %7 = vector.broadcast %cst_2 : f32 to vector<16x128xf32>
    %8 = arith.mulf %7, %6 : vector<16x128xf32>
    %cst_3 = arith.constant 5.000000e-01 : f32
    %9 = vector.broadcast %cst_3 : f32 to vector<16x128xf32>
    %10 = arith.addf %8, %9 : vector<16x128xf32>
    %c0_4 = arith.constant 0 : index
    %c0_5 = arith.constant 0 : index
    %11 = vector.load %arg3[%c0_4, %c0_5] : memref<16x128xf32, #tpu.memory_space<vmem>>, vector<16x128xf32>
    %c0_6 = arith.constant 0 : index
    %c0_7 = arith.constant 0 : index
    %12 = vector.load %arg6[%c0_6, %c0_7] : memref<8x128xf32, #tpu.memory_space<vmem>>, vector<8x128xf32>
    %13 = arith.mulf %10, %11 : vector<16x128xf32>
    %14 = vector.shape_cast %13 : vector<16x128xf32> to vector<2x8x128xf32>
    %cst_8 = arith.constant dense<0.000000e+00> : vector<8x128xf32>
    %15 = vector.multi_reduction <add>, %14, %cst_8 [0] : vector<2x8x128xf32> to vector<8x128xf32>
    %16 = arith.addf %12, %15 : vector<8x128xf32>
    %c0_9 = arith.constant 0 : index
    %c0_10 = arith.constant 0 : index
    %17 = vector.load %arg6[%c0_9, %c0_10] : memref<8x128xf32, #tpu.memory_space<vmem>>, vector<8x128xf32>
    tpu.vector_store %arg6[%c0_9, %c0_10], %16 {strides = array<i32>} : memref<8x128xf32, #tpu.memory_space<vmem>>, vector<8x128xf32>,
    %c0_11 = arith.constant 0 : index
    %c0_12 = arith.constant 0 : index
    %18 = vector.load %arg7[%c0_11, %c0_12] : memref<8x128xf32, #tpu.memory_space<vmem>>, vector<8x128xf32>
    %19 = arith.addf %10, %11 : vector<16x128xf32>
    %20 = vector.shape_cast %19 : vector<16x128xf32> to vector<2x8x128xf32>
    %cst_13 = arith.constant dense<0.000000e+00> : vector<8x128xf32>
    %21 = vector.multi_reduction <add>, %20, %cst_13 [0] : vector<2x8x128xf32> to vector<8x128xf32>
    %22 = arith.addf %18, %21 : vector<8x128xf32>
    %c0_14 = arith.constant 0 : index
    %c0_15 = arith.constant 0 : index
    %23 = vector.load %arg7[%c0_14, %c0_15] : memref<8x128xf32, #tpu.memory_space<vmem>>, vector<8x128xf32>
    tpu.vector_store %arg7[%c0_14, %c0_15], %22 {strides = array<i32>} : memref<8x128xf32, #tpu.memory_space<vmem>>, vector<8x128xf32>,
    %c0_i32_16 = arith.constant 0 : i32
    %24 = arith.cmpi eq, %arg1, %c0_i32_16 : i32
    %25 = arith.extui %24 : i1 to i32
    %c0_i32_17 = arith.constant 0 : i32
    %26 = arith.cmpi ne, %25, %c0_i32_17 : i32
    scf.if %26 {
      %c0_18 = arith.constant 0 : index
      %c0_19 = arith.constant 0 : index
      %27 = vector.load %arg6[%c0_18, %c0_19] : memref<8x128xf32, #tpu.memory_space<vmem>>, vector<8x128xf32>
      %c0_20 = arith.constant 0 : index
      %c0_21 = arith.constant 0 : index
      %c0_22 = arith.constant 0 : index
      %28 = vector.load %arg4[%c0_20, %c0_21, %c0_22] : memref<1x8x128xf32, #tpu.memory_space<vmem>>, vector<1x8x128xf32>
      %29 = vector.shape_cast %28 : vector<1x8x128xf32> to vector<8x128xf32>
      %30 = vector.shape_cast %27 : vector<8x128xf32> to vector<1x8x128xf32>
      tpu.vector_store %arg4[%c0_20, %c0_21, %c0_22], %30 {strides = array<i32>} : memref<1x8x128xf32, #tpu.memory_space<vmem>>, vector<1x8x128xf32>,
      %c0_23 = arith.constant 0 : index
      %c0_24 = arith.constant 0 : index
      %31 = vector.load %arg7[%c0_23, %c0_24] : memref<8x128xf32, #tpu.memory_space<vmem>>, vector<8x128xf32>
      %c0_25 = arith.constant 0 : index
      %c0_26 = arith.constant 0 : index
      %c0_27 = arith.constant 0 : index
      %32 = vector.load %arg5[%c0_25, %c0_26, %c0_27] : memref<1x8x128xf32, #tpu.memory_space<vmem>>, vector<1x8x128xf32>
      %33 = vector.shape_cast %32 : vector<1x8x128xf32> to vector<8x128xf32>
      %34 = vector.shape_cast %31 : vector<8x128xf32> to vector<1x8x128xf32>
      tpu.vector_store %arg5[%c0_25, %c0_26, %c0_27], %34 {strides = array<i32>} : memref<1x8x128xf32, #tpu.memory_space<vmem>>, vector<1x8x128xf32>,
    } else {
    }
    return
  }
  func.func @transform_0(%arg0: i32, %arg1: i32) -> (i32, i32) {
    %c1_i32 = arith.constant 1 : i32
    %0 = arith.muli %arg0, %c1_i32 : i32
    %1 = arith.addi %0, %arg1 : i32
    %c0_i32 = arith.constant 0 : i32
    %c0_i32_0 = arith.constant 0 : i32
    return %1, %c0_i32 : i32, i32
  }
  func.func @transform_1(%arg0: i32, %arg1: i32) -> (i32, i32) {
    %c1_i32 = arith.constant 1 : i32
    %0 = arith.muli %arg0, %c1_i32 : i32
    %1 = arith.addi %0, %arg1 : i32
    %c0_i32 = arith.constant 0 : i32
    %c0_i32_0 = arith.constant 0 : i32
    return %1, %c0_i32 : i32, i32
  }
  func.func @transform_2(%arg0: i32, %arg1: i32) -> (i32, i32, i32) {
    %c0_i32 = arith.constant 0 : i32
    %c0_i32_0 = arith.constant 0 : i32
    %c0_i32_1 = arith.constant 0 : i32
    return %arg0, %c0_i32, %c0_i32_0 : i32, i32, i32
  }
  func.func @transform_3(%arg0: i32, %arg1: i32) -> (i32, i32, i32) {
    %c0_i32 = arith.constant 0 : i32
    %c0_i32_0 = arith.constant 0 : i32
    %c0_i32_1 = arith.constant 0 : i32
    return %arg0, %c0_i32, %c0_i32_0 : i32, i32, i32
  }
}

</mosaic_0001>

<bundles_post_ra>
// kernel: tpu_custom_call.1
= control target key start
LH: loop header
LB: loop body
LE: loop exit
PB: predicated region body
PF: predicated region fallthrough
CT: control target
= control target key end

     0   :  { %9 = vsyncpa [#allocation5], 0  ;;  %s302_s0 = inlined_call_operand.hbm [shape: f32[16,128], index: 0, kind: input, shape index: {}]   ;;  %s303_s1 = inlined_call_operand.hbm [shape: f32[16,128], index: 1, kind: input, shape index: {}]   ;;  %s304_s2 = inlined_call_operand.hbm [shape: f32[1,8,128], index: 2, kind: output, shape index: {0}]   ;;  %s305_s3 = inlined_call_operand.hbm [shape: f32[1,8,128], index: 3, kind: output, shape index: {1}]  }
   0x1   :  { %10 = vsyncpa [#allocation8], 0 }
   0x2   :  { %11 = vsyncpa [#allocation6], 0 }
   0x3   :  { %12 = vsyncpa [#allocation11], 0  ;;  %s228_s12 = smov [#allocation4]   ;;  %s132_s16 = scalar_lea.hbm %s302_s0, 256 }
   0x4   :  { %s22_s13 = sshll.u32 %s228_s12, 4  ;;  %p133_p0 = scmp.ne.s32.totalorder %s302_s0, %s132_s16  ;;  %s23_s13 = int_to_ptr.vmem [resolvable:$true] %s22_s13 }
   0x5   :  { %p136_p1 = scmp.lt.u32.totalorder %s132_s16, %s302_s0 }
   0x7   :  { %p138_p2 = pnand %p136_p1, %p133_p0 }
   0x9   :  { %141 = shalt.err (!%p138_p2)
}
   0xa   :  { %s142_s21 = scalar_lea.vmem %s23_s13, 256  ;;  %p147_p4 = scmp.lt.s32.totalorder %s23_s13, %s23_s13 }
   0xb   :  { %p143_p3 = scmp.ne.s32.totalorder %s23_s13, %s142_s21  ;;  %p148_p5 = scmp.lt.s32.totalorder %s142_s21, %s142_s21 }
   0xd   :  { %p149_p6 = por %p148_p5, %p147_p4 }
   0xf   :  { %p150_p7 = pnand %p149_p6, %p143_p3 }
  0x11   :  { %153 = shalt.err (!%p150_p7)
}
  0x12   :  { %s229_s22 = smov 128   ;;  %s230_s23 = smov 8  }
  0x13   :  { %28 = dma.hbm_to_vmem [thread:$0]  %s302_s0, 256, %s23_s13, [#allocation5], %s229_s22, %s229_s22, %s230_s23  }
  0x14   :  { %s231_s26 = smov [#allocation7]   ;;  %s154_s30 = scalar_lea.hbm %s303_s1, 256 }
  0x15   :  { %s38_s27 = sshll.u32 %s231_s26, 4  ;;  %p155_p8 = scmp.ne.s32.totalorder %s303_s1, %s154_s30  ;;  %s39_s27 = int_to_ptr.vmem [resolvable:$true] %s38_s27 }
  0x16   :  { %p158_p9 = scmp.lt.u32.totalorder %s154_s30, %s303_s1 }
  0x18   :  { %p160_p10 = pnand %p158_p9, %p155_p8 }
  0x1a   :  { %163 = shalt.err (!%p160_p10)
}
  0x1b   :  { %s164_s8 = scalar_lea.vmem %s39_s27, 256  ;;  %p169_p12 = scmp.lt.s32.totalorder %s39_s27, %s39_s27 }
  0x1c   :  { %p165_p11 = scmp.ne.s32.totalorder %s39_s27, %s164_s8  ;;  %p170_p13 = scmp.lt.s32.totalorder %s164_s8, %s164_s8 }
  0x1e   :  { %p171_p0 = por %p170_p13, %p169_p12 }
  0x20   :  { %p172_p1 = pnand %p171_p0, %p165_p11 }
  0x22   :  { %175 = shalt.err (!%p172_p1)
}
  0x23   :  { %44 = dma.hbm_to_vmem [thread:$0]  %s303_s1, 256, %s39_s27, [#allocation8], %s229_s22, %s229_s22, %s230_s23  }
  0x24   :  { %220 = dma.done.wait [#allocation5], 256  }
  0x25   :  { %221 = vsyncadd [#allocation5], 4294967040 }
  0x26   :  { %222 = dma.done.wait [#allocation8], 256  }
  0x27   :  { %223 = vsyncadd [#allocation8], 4294967040  ;;  %v61_v0 = vld [vmem:[#allocation4] sm:$0xff]  ;;  %v62_v1 = vld [vmem:[#allocation4 + $0x8] sm:$0xff]  ;;  %s232_s1 = smov [#allocation9]   ;;  %s233_s11 = smov [#allocation10]  }
  0x28   :  { %v63_v2 = vmul.f32 0.5, %v61_v0  ;;  %v64_v3 = vmul.f32 0.5, %v62_v1  ;;  %v71_v8 = vld [vmem:[#allocation7] sm:$0xff]  ;;  %v72_v10 = vld [vmem:[#allocation7 + $0x8] sm:$0xff]  ;;  %s98_s10 = sshll.u32 %s232_s1, 4  ;;  %s108_s12 = sshll.u32 %s233_s11, 4  ;;  %s99_s10 = int_to_ptr.vmem [resolvable:$true] %s98_s10  ;;  %s109_s12 = int_to_ptr.vmem [resolvable:$true] %s108_s12 }
  0x29   :  { %s176_s13 = scalar_lea.vmem %s99_s10, 128  ;;  %p181_p3 = scmp.lt.s32.totalorder %s99_s10, %s99_s10 }
  0x2a   :  { %128 = vtanh.f32 %v63_v2  ;;  %p177_p2 = scmp.ne.s32.totalorder %s99_s10, %s176_s13  ;;  %p182_p4 = scmp.lt.s32.totalorder %s176_s13, %s176_s13 }
  0x2b   :  { %130 = vtanh.f32 %v64_v3 }
  0x2c   :  { %p183_p5 = por %p182_p4, %p181_p3 }
  0x2e   :  { %p184_p6 = pnand %p183_p5, %p177_p2 }
  0x34   :  { %v129_v4 = vpop.eup %128 }
  0x35   :  { %v131_v5 = vpop.eup %130  ;;  %v67_v6 = vmul.f32 0.5, %v129_v4 }
  0x36   :  { %v68_v7 = vmul.f32 0.5, %v131_v5 }
  0x37   :  { %v69_v9 = vadd.f32 0.5, %v67_v6 }
  0x38   :  { %v70_v11 = vadd.f32 0.5, %v68_v7 }
  0x39   :  { %v74_v12 = vmul.f32 %v71_v8, %v69_v9  ;;  %v80_v13 = vadd.f32 %v71_v8, %v69_v9 }
  0x3a   :  { %v75_v14 = vmul.f32 %v72_v10, %v70_v11  ;;  %v81_v15 = vadd.f32 %v72_v10, %v70_v11 }
  0x3c   :  { %v76_v16 = vadd.f32 %v75_v14, %v74_v12  ;;  %v82_v17 = vadd.f32 %v81_v15, %v80_v13 }
  0x3e   :  { %89 = vst [vmem:[#allocation9] sm:$0xff] %v76_v16  ;;  %91 = vst [vmem:[#allocation10] sm:$0xff] %v82_v17 }
  0x3f   :  { %187 = shalt.err (!%p184_p6)
}
  0x40   :  { %s188_s16 = scalar_lea.hbm %s304_s2, 128 }
  0x41   :  { %p189_p7 = scmp.ne.s32.totalorder %s304_s2, %s188_s16  ;;  %p192_p8 = scmp.lt.u32.totalorder %s188_s16, %s304_s2 }
  0x43   :  { %p194_p9 = pnand %p192_p8, %p189_p7 }
  0x45   :  { %197 = shalt.err (!%p194_p9)
}
  0x46   :  { %101 = dma.vmem_to_hbm [thread:$0]  %s99_s10, 128, %s304_s2, [#allocation6]  }
  0x47   :  { %s198_s23 = scalar_lea.vmem %s109_s12, 128  ;;  %p203_p11 = scmp.lt.s32.totalorder %s109_s12, %s109_s12 }
  0x48   :  { %p199_p10 = scmp.ne.s32.totalorder %s109_s12, %s198_s23  ;;  %p204_p12 = scmp.lt.s32.totalorder %s198_s23, %s198_s23 }
  0x4a   :  { %p205_p13 = por %p204_p12, %p203_p11 }
  0x4c   :  { %p206_p0 = pnand %p205_p13, %p199_p10 }
  0x4e   :  { %209 = shalt.err (!%p206_p0)
}
  0x4f   :  { %s210_s26 = scalar_lea.hbm %s305_s3, 128 }
  0x50   :  { %p211_p1 = scmp.ne.s32.totalorder %s305_s3, %s210_s26  ;;  %p214_p2 = scmp.lt.u32.totalorder %s210_s26, %s305_s3 }
  0x52   :  { %p216_p3 = pnand %p214_p2, %p211_p1 }
  0x54   :  { %219 = shalt.err (!%p216_p3)
}
  0x55   :  { %111 = dma.vmem_to_hbm [thread:$0]  %s109_s12, 128, %s305_s3, [#allocation11]  }
  0x56   :  { %224 = dma.done.wait [#allocation6], 128  }
  0x57   :  { %225 = vsyncadd [#allocation6], 4294967168 }
  0x58   :  { %226 = dma.done.wait [#allocation11], 128  }
  0x59   :  { %227 = vsyncadd [#allocation11], 4294967168 }
  0x5a   :  { %118 = vsyncpa [#allocation5], 1 }
  0x5b   :  { %119 = vsyncpa [#allocation8], 1 }
  0x5c   :  { %120 = vsyncpa [#allocation6], 1 }
  0x5d   :  { %121 = vsyncpa [#allocation11], 1 }

</bundles_post_ra>
